<compile_context>
chip_gen: v7x
topology: tpu7x:2x2x1
jax: 0.10.0
libtpu: 0.0.40
codegen_flags: <defaults>
</compile_context>

<pallas_src>
import jax
import jax.numpy as jnp
from jax.experimental import pallas as pl
from jax.experimental.pallas import tpu as pltpu

_SMALL_BYTES = 2 << 20   # <= 2 MiB: single full-array VMEM block, grid-less
_BLOCK_BYTES = 2 << 20   # large-input path: ~2 MiB per pipelined block


def _relu_kernel(x_ref, o_ref):
    # One VPU vmax per vreg; scalar 0.0 folds into the immediate path.
    o_ref[...] = jnp.maximum(x_ref[...], 0.0)


def _lane_dense_view(x):
    """Free (contiguous) 2D reshape with a packed sublane dim and wide lanes."""
    total = x.size
    packing = max(1, 4 // jnp.dtype(x.dtype).itemsize)  # f32->1, bf16->2, i8->4
    sub = 8 * packing
    if total % sub == 0:
        return x.reshape(sub, total // sub)
    if total % 8 == 0:
        return x.reshape(8, total // 8)
    if x.ndim >= 2:
        return x.reshape(-1, x.shape[-1])
    return x.reshape(1, total)


def _relu_pallas_impl(x):
    nbytes = x.size * jnp.dtype(x.dtype).itemsize
    x2d = _lane_dense_view(x)
    rows, cols = x2d.shape

    if nbytes <= _SMALL_BYTES:
        # Grid-less call: whole tensor as one VMEM block (in and out).
        out2d = pl.pallas_call(
            _relu_kernel,
            out_shape=jax.ShapeDtypeStruct((rows, cols), x.dtype),
        )(x2d)
    else:
        # Tile the lane dimension; block last dim is a multiple of 128 and
        # second-to-last equals the full (packed) row dim, so every store is
        # an unmasked full-width vst except possibly the final partial block.
        itemsize = jnp.dtype(x.dtype).itemsize
        block_cols = max(128, (_BLOCK_BYTES // (rows * itemsize)) // 128 * 128)
        block_cols = min(block_cols, pl.cdiv(cols, 128) * 128)
        grid = (pl.cdiv(cols, block_cols),)
        out2d = pl.pallas_call(
            _relu_kernel,
            out_shape=jax.ShapeDtypeStruct((rows, cols), x.dtype),
            grid_spec=pltpu.PrefetchScalarGridSpec(
                num_scalar_prefetch=0,
                grid=grid,
                in_specs=[pl.BlockSpec((rows, block_cols), lambda i: (0, i))],
                out_specs=pl.BlockSpec((rows, block_cols), lambda i: (0, i)),
            ),
            compiler_params=pltpu.CompilerParams(
                dimension_semantics=("parallel",),
            ),
        )(x2d)

    return out2d.reshape(x.shape)


# jit so the (free) reshape metadata ops sit in the same executable.
relu_pallas = jax.jit(_relu_pallas_impl)


if __name__ == "__main__":
    key = jax.random.PRNGKey(0)
    # Same shape as the PyTorch module's input: [1, 1104, 7, 7]
    x = jax.random.normal(key, (1, 1104, 7, 7), dtype=jnp.float32)

    y = relu_pallas(x)
    jax.block_until_ready(y)

    # Sanity check against the pure-JAX reference.
    y_ref = jnp.maximum(x, 0.0)
    assert y.shape == x.shape
    assert jnp.allclose(y, y_ref), "ReLU mismatch vs reference"

    print("KERNEL_OK")
</pallas_src>

<mosaic_0001>
module attributes {stable_mosaic.version = 11 : i64} {
  func.func @_relu_kernel(%arg0: memref<8x6762xf32, #tpu.memory_space<vmem>>, %arg1: memref<8x6762xf32, #tpu.memory_space<vmem>>) attributes {dimension_semantics = [], scalar_prefetch = 0 : i64, scratch_operands = 0 : i64, tpu.core_type = #tpu.core_type<tc>} {
    %c0 = arith.constant 0 : index
    %c0_0 = arith.constant 0 : index
    %0 = vector.load %arg0[%c0, %c0_0] : memref<8x6762xf32, #tpu.memory_space<vmem>>, vector<8x6762xf32>
    %cst = arith.constant 0.000000e+00 : f32
    %1 = vector.broadcast %cst : f32 to vector<8x6762xf32>
    %2 = arith.maximumf %0, %1 : vector<8x6762xf32>
    %c0_1 = arith.constant 0 : index
    %c0_2 = arith.constant 0 : index
    %3 = vector.load %arg1[%c0_1, %c0_2] : memref<8x6762xf32, #tpu.memory_space<vmem>>, vector<8x6762xf32>
    tpu.vector_store %arg1[%c0_1, %c0_2], %2 {strides = array<i32>} : memref<8x6762xf32, #tpu.memory_space<vmem>>, vector<8x6762xf32>,
    return
  }
}

</mosaic_0001>

<bundles_post_ra>
// kernel: _relu_pallas_impl.1
= control target key start
LH: loop header
LB: loop body
LE: loop exit
PB: predicated region body
PF: predicated region fallthrough
CT: control target
= control target key end

     0   :  { %vm166_vm0 = vcmask 867328   ;;  %s500_s0 = inlined_call_operand.vmem [shape: f32[8,6762], index: 0, kind: input, shape index: {}]   ;;  %s501_s1 = inlined_call_operand.vmem [shape: f32[8,6762], index: 1, kind: output, shape index: {}]  }
   0x1   :  { %v8_v0 = vld [vmem:[%s500_s0] sm:$0xff]  ;;  %v9_v1 = vld [vmem:[%s500_s0 + $0x8] sm:$0xff]  ;;  %v10_v2 = vld [vmem:[%s500_s0 + $0x10] sm:$0xff] }
   0x2   :  { %v61_v3 = vmax.f32 %v8_v0, 0.0  ;;  %v62_v4 = vmax.f32 %v9_v1, 0.0  ;;  %v63_v5 = vmax.f32 %v10_v2, 0.0  ;;  %v11_v6 = vld [vmem:[%s500_s0 + $0x18] sm:$0xff]  ;;  %v12_v7 = vld [vmem:[%s500_s0 + $0x20] sm:$0xff]  ;;  %v13_v8 = vld [vmem:[%s500_s0 + $0x28] sm:$0xff] }
   0x3   :  { %v64_v9 = vmax.f32 %v11_v6, 0.0  ;;  %v65_v10 = vmax.f32 %v12_v7, 0.0  ;;  %v66_v11 = vmax.f32 %v13_v8, 0.0  ;;  %v14_v12 = vld [vmem:[%s500_s0 + $0x30] sm:$0xff]  ;;  %v15_v13 = vld [vmem:[%s500_s0 + $0x38] sm:$0xff]  ;;  %v16_v14 = vld [vmem:[%s500_s0 + $0x40] sm:$0xff] }
   0x4   :  { %114 = vst [vmem:[%s501_s1] sm:$0xff] %v61_v3  ;;  %115 = vst [vmem:[%s501_s1 + $0x8] sm:$0xff] %v62_v4  ;;  %v67_v15 = vmax.f32 %v14_v12, 0.0  ;;  %v68_v16 = vmax.f32 %v15_v13, 0.0  ;;  %v69_v17 = vmax.f32 %v16_v14, 0.0  ;;  %v17_v18 = vld [vmem:[%s500_s0 + $0x48] sm:$0xff]  ;;  %v18_v19 = vld [vmem:[%s500_s0 + $0x50] sm:$0xff] }
   0x5   :  { %116 = vst [vmem:[%s501_s1 + $0x10] sm:$0xff] %v63_v5  ;;  %v19_v20 = vld [vmem:[%s500_s0 + $0x58] sm:$0xff]  ;;  %117 = vst [vmem:[%s501_s1 + $0x18] sm:$0xff] %v64_v9  ;;  %v70_v21 = vmax.f32 %v17_v18, 0.0  ;;  %v71_v22 = vmax.f32 %v18_v19, 0.0  ;;  %v20_v24 = vld [vmem:[%s500_s0 + $0x60] sm:$0xff] }
   0x6   :  { %118 = vst [vmem:[%s501_s1 + $0x20] sm:$0xff] %v65_v10  ;;  %119 = vst [vmem:[%s501_s1 + $0x28] sm:$0xff] %v66_v11  ;;  %v72_v23 = vmax.f32 %v19_v20, 0.0  ;;  %v21_v25 = vld [vmem:[%s500_s0 + $0x68] sm:$0xff]  ;;  %v22_v26 = vld [vmem:[%s500_s0 + $0x70] sm:$0xff]  ;;  %v73_v27 = vmax.f32 %v20_v24, 0.0 }
   0x7   :  { %120 = vst [vmem:[%s501_s1 + $0x30] sm:$0xff] %v67_v15  ;;  %121 = vst [vmem:[%s501_s1 + $0x38] sm:$0xff] %v68_v16  ;;  %v74_v28 = vmax.f32 %v21_v25, 0.0  ;;  %v75_v29 = vmax.f32 %v22_v26, 0.0  ;;  %v23_v30 = vld [vmem:[%s500_s0 + $0x78] sm:$0xff]  ;;  %v24_v31 = vld [vmem:[%s500_s0 + $0x80] sm:$0xff] }
   0x8   :  { %122 = vst [vmem:[%s501_s1 + $0x40] sm:$0xff] %v69_v17  ;;  %v25_v32 = vld [vmem:[%s500_s0 + $0x88] sm:$0xff]  ;;  %123 = vst [vmem:[%s501_s1 + $0x48] sm:$0xff] %v70_v21  ;;  %v76_v33 = vmax.f32 %v23_v30, 0.0  ;;  %v77_v34 = vmax.f32 %v24_v31, 0.0  ;;  %v26_v36 = vld [vmem:[%s500_s0 + $0x90] sm:$0xff] }
   0x9   :  { %124 = vst [vmem:[%s501_s1 + $0x50] sm:$0xff] %v71_v22  ;;  %125 = vst [vmem:[%s501_s1 + $0x58] sm:$0xff] %v72_v23  ;;  %v78_v35 = vmax.f32 %v25_v32, 0.0  ;;  %v27_v37 = vld [vmem:[%s500_s0 + $0x98] sm:$0xff]  ;;  %v28_v38 = vld [vmem:[%s500_s0 + $0xa0] sm:$0xff]  ;;  %v79_v39 = vmax.f32 %v26_v36, 0.0 }
   0xa   :  { %126 = vst [vmem:[%s501_s1 + $0x60] sm:$0xff] %v73_v27  ;;  %127 = vst [vmem:[%s501_s1 + $0x68] sm:$0xff] %v74_v28  ;;  %v80_v40 = vmax.f32 %v27_v37, 0.0  ;;  %v81_v41 = vmax.f32 %v28_v38, 0.0  ;;  %v29_v42 = vld [vmem:[%s500_s0 + $0xa8] sm:$0xff]  ;;  %v30_v43 = vld [vmem:[%s500_s0 + $0xb0] sm:$0xff] }
   0xb   :  { %128 = vst [vmem:[%s501_s1 + $0x70] sm:$0xff] %v75_v29  ;;  %v31_v44 = vld [vmem:[%s500_s0 + $0xb8] sm:$0xff]  ;;  %129 = vst [vmem:[%s501_s1 + $0x78] sm:$0xff] %v76_v33  ;;  %v82_v45 = vmax.f32 %v29_v42, 0.0  ;;  %v83_v46 = vmax.f32 %v30_v43, 0.0  ;;  %v32_v48 = vld [vmem:[%s500_s0 + $0xc0] sm:$0xff] }
   0xc   :  { %130 = vst [vmem:[%s501_s1 + $0x80] sm:$0xff] %v77_v34  ;;  %131 = vst [vmem:[%s501_s1 + $0x88] sm:$0xff] %v78_v35  ;;  %v84_v47 = vmax.f32 %v31_v44, 0.0  ;;  %v33_v49 = vld [vmem:[%s500_s0 + $0xc8] sm:$0xff]  ;;  %v34_v50 = vld [vmem:[%s500_s0 + $0xd0] sm:$0xff]  ;;  %v85_v51 = vmax.f32 %v32_v48, 0.0 }
   0xd   :  { %132 = vst [vmem:[%s501_s1 + $0x90] sm:$0xff] %v79_v39  ;;  %133 = vst [vmem:[%s501_s1 + $0x98] sm:$0xff] %v80_v40  ;;  %v86_v52 = vmax.f32 %v33_v49, 0.0  ;;  %v87_v53 = vmax.f32 %v34_v50, 0.0  ;;  %v35_v54 = vld [vmem:[%s500_s0 + $0xd8] sm:$0xff]  ;;  %v36_v55 = vld [vmem:[%s500_s0 + $0xe0] sm:$0xff] }
   0xe   :  { %134 = vst [vmem:[%s501_s1 + $0xa0] sm:$0xff] %v81_v41  ;;  %v37_v56 = vld [vmem:[%s500_s0 + $0xe8] sm:$0xff]  ;;  %135 = vst [vmem:[%s501_s1 + $0xa8] sm:$0xff] %v82_v45  ;;  %v88_v57 = vmax.f32 %v35_v54, 0.0  ;;  %v89_v58 = vmax.f32 %v36_v55, 0.0  ;;  %v38_v60 = vld [vmem:[%s500_s0 + $0xf0] sm:$0xff] }
   0xf   :  { %136 = vst [vmem:[%s501_s1 + $0xb0] sm:$0xff] %v83_v46  ;;  %137 = vst [vmem:[%s501_s1 + $0xb8] sm:$0xff] %v84_v47  ;;  %v90_v59 = vmax.f32 %v37_v56, 0.0  ;;  %v39_v61 = vld [vmem:[%s500_s0 + $0xf8] sm:$0xff]  ;;  %v40_v62 = vld [vmem:[%s500_s0 + $0x100] sm:$0xff]  ;;  %v91_v63 = vmax.f32 %v38_v60, 0.0 }
  0x10   :  { %138 = vst [vmem:[%s501_s1 + $0xc0] sm:$0xff] %v85_v51  ;;  %139 = vst [vmem:[%s501_s1 + $0xc8] sm:$0xff] %v86_v52  ;;  %v92_v0 = vmax.f32 %v39_v61, 0.0  ;;  %v93_v1 = vmax.f32 %v40_v62, 0.0  ;;  %v41_v2 = vld [vmem:[%s500_s0 + $0x108] sm:$0xff]  ;;  %v42_v3 = vld [vmem:[%s500_s0 + $0x110] sm:$0xff] }
  0x11   :  { %140 = vst [vmem:[%s501_s1 + $0xd0] sm:$0xff] %v87_v53  ;;  %v43_v4 = vld [vmem:[%s500_s0 + $0x118] sm:$0xff]  ;;  %141 = vst [vmem:[%s501_s1 + $0xd8] sm:$0xff] %v88_v57  ;;  %v94_v5 = vmax.f32 %v41_v2, 0.0  ;;  %v95_v6 = vmax.f32 %v42_v3, 0.0  ;;  %v44_v8 = vld [vmem:[%s500_s0 + $0x120] sm:$0xff] }
  0x12   :  { %142 = vst [vmem:[%s501_s1 + $0xe0] sm:$0xff] %v89_v58  ;;  %143 = vst [vmem:[%s501_s1 + $0xe8] sm:$0xff] %v90_v59  ;;  %v96_v7 = vmax.f32 %v43_v4, 0.0  ;;  %v45_v9 = vld [vmem:[%s500_s0 + $0x128] sm:$0xff]  ;;  %v46_v10 = vld [vmem:[%s500_s0 + $0x130] sm:$0xff]  ;;  %v97_v11 = vmax.f32 %v44_v8, 0.0 }
  0x13   :  { %144 = vst [vmem:[%s501_s1 + $0xf0] sm:$0xff] %v91_v63  ;;  %145 = vst [vmem:[%s501_s1 + $0xf8] sm:$0xff] %v92_v0  ;;  %v98_v12 = vmax.f32 %v45_v9, 0.0  ;;  %v99_v13 = vmax.f32 %v46_v10, 0.0  ;;  %v47_v14 = vld [vmem:[%s500_s0 + $0x138] sm:$0xff]  ;;  %v48_v15 = vld [vmem:[%s500_s0 + $0x140] sm:$0xff] }
  0x14   :  { %146 = vst [vmem:[%s501_s1 + $0x100] sm:$0xff] %v93_v1  ;;  %v49_v16 = vld [vmem:[%s500_s0 + $0x148] sm:$0xff]  ;;  %147 = vst [vmem:[%s501_s1 + $0x108] sm:$0xff] %v94_v5  ;;  %v100_v17 = vmax.f32 %v47_v14, 0.0  ;;  %v101_v18 = vmax.f32 %v48_v15, 0.0  ;;  %v50_v20 = vld [vmem:[%s500_s0 + $0x150] sm:$0xff] }
  0x15   :  { %148 = vst [vmem:[%s501_s1 + $0x110] sm:$0xff] %v95_v6  ;;  %149 = vst [vmem:[%s501_s1 + $0x118] sm:$0xff] %v96_v7  ;;  %v102_v19 = vmax.f32 %v49_v16, 0.0  ;;  %v51_v21 = vld [vmem:[%s500_s0 + $0x158] sm:$0xff]  ;;  %v52_v22 = vld [vmem:[%s500_s0 + $0x160] sm:$0xff]  ;;  %v103_v23 = vmax.f32 %v50_v20, 0.0 }
  0x16   :  { %150 = vst [vmem:[%s501_s1 + $0x120] sm:$0xff] %v97_v11  ;;  %151 = vst [vmem:[%s501_s1 + $0x128] sm:$0xff] %v98_v12  ;;  %v104_v24 = vmax.f32 %v51_v21, 0.0  ;;  %v105_v25 = vmax.f32 %v52_v22, 0.0  ;;  %v53_v26 = vld [vmem:[%s500_s0 + $0x168] sm:$0xff]  ;;  %v54_v27 = vld [vmem:[%s500_s0 + $0x170] sm:$0xff] }
  0x17   :  { %152 = vst [vmem:[%s501_s1 + $0x130] sm:$0xff] %v99_v13  ;;  %v55_v28 = vld [vmem:[%s500_s0 + $0x178] sm:$0xff]  ;;  %153 = vst [vmem:[%s501_s1 + $0x138] sm:$0xff] %v100_v17  ;;  %v106_v29 = vmax.f32 %v53_v26, 0.0  ;;  %v107_v30 = vmax.f32 %v54_v27, 0.0  ;;  %v56_v32 = vld [vmem:[%s500_s0 + $0x180] sm:$0xff] }
  0x18   :  { %154 = vst [vmem:[%s501_s1 + $0x140] sm:$0xff] %v101_v18  ;;  %155 = vst [vmem:[%s501_s1 + $0x148] sm:$0xff] %v102_v19  ;;  %v108_v31 = vmax.f32 %v55_v28, 0.0  ;;  %v57_v33 = vld [vmem:[%s500_s0 + $0x188] sm:$0xff]  ;;  %v58_v34 = vld [vmem:[%s500_s0 + $0x190] sm:$0xff]  ;;  %v109_v35 = vmax.f32 %v56_v32, 0.0 }
  0x19   :  { %156 = vst [vmem:[%s501_s1 + $0x150] sm:$0xff] %v103_v23  ;;  %157 = vst [vmem:[%s501_s1 + $0x158] sm:$0xff] %v104_v24  ;;  %v110_v36 = vmax.f32 %v57_v33, 0.0  ;;  %v111_v37 = vmax.f32 %v58_v34, 0.0  ;;  %v59_v38 = vld [vmem:[%s500_s0 + $0x198] sm:$0xff]  ;;  %v60_v39 = vld [vmem:[%s500_s0 + $0x1a0] sm:$0xff] }
  0x1a   :  { %158 = vst [vmem:[%s501_s1 + $0x160] sm:$0xff] %v105_v25  ;;  %159 = vst [vmem:[%s501_s1 + $0x168] sm:$0xff] %v106_v29  ;;  %v112_v40 = vmax.f32 %v59_v38, 0.0  ;;  %v113_v41 = vmax.f32 %v60_v39, 0.0 }
  0x1b   :  { %160 = vst [vmem:[%s501_s1 + $0x170] sm:$0xff] %v107_v30  ;;  %161 = vst [vmem:[%s501_s1 + $0x178] sm:$0xff] %v108_v31 }
  0x1c   :  { %162 = vst [vmem:[%s501_s1 + $0x180] sm:$0xff] %v109_v35  ;;  %163 = vst [vmem:[%s501_s1 + $0x188] sm:$0xff] %v110_v36 }
  0x1d   :  { %164 = vst [vmem:[%s501_s1 + $0x190] sm:$0xff] %v111_v37  ;;  %165 = vst [vmem:[%s501_s1 + $0x198] sm:$0xff] %v112_v40 }
  0x1e   :  { %167 = vst.msk [vmem:[%s501_s1 + $0x1a0] sm:$0xff] %vm166_vm0, %v113_v41 }

</bundles_post_ra>
